<compile_context>
chip_gen: v7x
topology: tpu7x:2x2x1
jax: 0.10.0
libtpu: 0.0.40
codegen_flags: <defaults>
</compile_context>

<pallas_src>
import jax
import jax.numpy as jnp
from jax.experimental import pallas as pl
from jax.experimental.pallas import tpu as pltpu


# -----------------------------------------------------------------------------
# Generation-aware VMEM budget + tile pickers
# -----------------------------------------------------------------------------
def _detect_vmem_limit():
    cap = 64 << 20
    try:
        cap = int(getattr(pltpu.get_tpu_info(), "vmem_capacity_bytes", cap))
    except Exception:
        pass
    # ~75% of physical VMEM, clamped to [32 MiB, 96 MiB]
    return int(min(max((cap * 3) // 4, 32 << 20), 96 << 20))


_VMEM_LIMIT = _detect_vmem_limit()
_HEADROOM = 4 << 20          # compiler scratch / semaphores
_MIN_GRID_STEPS = 8          # keep >= 4 pipeline steps per TensorCore on v7x


def _min_lane_blocks(other_steps):
    return max(1, -(-_MIN_GRID_STEPS // max(1, other_steps)))


def _pick_lane_block(L, per_lane_bytes, fixed_bytes=0, min_blocks=1):
    """Largest lane block (128-multiple dividing L, or L itself) fitting VMEM.

    fixed_bytes (weights / bias / invariant tiles) are charged x2 for the
    pipeline's double buffering, as are the lane-sliced operands.
    """
    avail = _VMEM_LIMIT - _HEADROOM - 2 * fixed_bytes
    cap = max(128, avail // max(1, 2 * per_lane_bytes))
    target = min(L, cap)
    if min_blocks > 1:
        target = min(target, max(128, L // min_blocks))
    if target >= L:
        return L
    blk = (target // 128) * 128
    while blk >= 128:
        if L % blk == 0:
            return int(blk)
        blk -= 128
    return L


def _theta_tiles(b, T, HW, C, c_red, d_red):
    """(frames-per-step, output-channel block) for the fused theta kernel."""
    budget = _VMEM_LIMIT - _HEADROOM

    def step_bytes(tb, cb):
        lane = tb * HW
        return (2 * lane * 2 * (c_red + d_red + cb)            # double-buffered bf16 inputs
                + 2 * (cb * (c_red + d_red) * 2 + 8 * cb)      # weights / bias / out buffers
                + 3 * cb * 4                                   # m / l / acc scratch
                + 3 * cb * lane * 4)                           # f32 intermediates (a, p, f)

    # lane blocks are whole frames; a partial-frame block must stay 128-aligned
    tb_opts = [t for t in range(T, 0, -1)
               if T % t == 0 and (t == T or (t * HW) % 128 == 0)]
    cb_opts = [c for c in range(C, 0, -1)
               if C % c == 0 and (c == C or c % 8 == 0)]
    tb, cb = tb_opts[-1], cb_opts[-1]
    done = False
    for t in tb_opts:
        for c in cb_opts:
            if step_bytes(t, c) <= budget:
                tb, cb, done = t, c, True
                break
        if done:
            break
    # v7x megacore: give both TensorCores a few pipeline steps when possible.
    while b * (C // cb) * (T // tb) < _MIN_GRID_STEPS:
        smaller = [c for c in cb_opts if c < cb]
        if not smaller:
            break
        cb = smaller[0]
    return tb, cb


# -----------------------------------------------------------------------------
# Channel statistics + BatchNorm fold (tiny CxC reductions, f32 accumulation)
# -----------------------------------------------------------------------------
def _channel_stats(x3):
    """Per-channel mean (C,) and covariance (C, C) over (batch, length).

    Operates on bf16 activations (halved HBM read) with f32 accumulation.
    Note: the E[xx^T] - mu mu^T form can cancel for badly-centred data;
    variances are clamped >= 0 before the fold.
    """
    N, _, L = x3.shape
    cnt = N * L
    mean = jnp.sum(x3, axis=(0, 2), dtype=jnp.float32) / cnt
    m2 = jnp.einsum('ncl,ndl->cd', x3, x3,
                    preferred_element_type=jnp.float32) / cnt
    return mean, m2 - jnp.outer(mean, mean)


def _fold_bn(w, bconv, gamma, beta, mean_x, cov_x, eps=1e-5):
    """Fold training-mode BatchNorm (biased batch stats) into a 1x1 conv.

    mean_y = W mean_x + b ;  var_y = diag(W cov_x W^T)  (conv is affine).
    """
    mean_y = w @ mean_x + bconv
    var_y = jnp.maximum(jnp.sum((w @ cov_x) * w, axis=1), 0.0)
    scale = gamma * jax.lax.rsqrt(var_y + eps)
    w_f = (w * scale[:, None]).astype(jnp.bfloat16)
    b_f = ((bconv - mean_y) * scale + beta).astype(jnp.float32)[:, None]
    return w_f, b_f


# -----------------------------------------------------------------------------
# Kernel 1: fused conv1x1 + folded BatchNorm + ReLU
# -----------------------------------------------------------------------------
def _conv_bn_relu_kernel(x_ref, w_ref, b_ref, o_ref):
    acc = jnp.dot(w_ref[...], x_ref[0], preferred_element_type=jnp.float32)
    o_ref[0] = jnp.maximum(acc + b_ref[...], 0.0).astype(o_ref.dtype)


def conv1x1_bn_relu(x3, w, bconv, gamma, beta, mean_x, cov_x,
                    out_dtype=jnp.bfloat16, eps=1e-5):
    """x3: (N, Cin, L) -> (N, Cout, L), fused conv1x1 + BN(train) + ReLU."""
    N, Cin, L = x3.shape
    Cout = w.shape[0]
    w_f, b_f = _fold_bn(w, bconv, gamma, beta, mean_x, cov_x, eps)
    x_b = x3.astype(jnp.bfloat16)
    out_isz = jnp.dtype(out_dtype).itemsize
    fixed = Cout * Cin * 2 + Cout * 4                 # folded weight + bias buffers
    per_lane = Cin * 2 + Cout * out_isz
    Lb = _pick_lane_block(L, per_lane, fixed, _min_lane_blocks(N))
    grid = (N, L // Lb)

    return pl.pallas_call(
        _conv_bn_relu_kernel,
        out_shape=jax.ShapeDtypeStruct((N, Cout, L), out_dtype),
        grid=grid,
        in_specs=[
            pl.BlockSpec((1, Cin, Lb), lambda n, j: (n, 0, j)),
            pl.BlockSpec((Cout, Cin), lambda n, j: (0, 0)),
            pl.BlockSpec((Cout, 1), lambda n, j: (0, 0)),
        ],
        out_specs=pl.BlockSpec((1, Cout, Lb), lambda n, j: (n, 0, j)),
        compiler_params=pltpu.CompilerParams(
            dimension_semantics=("parallel", "parallel"),
            vmem_limit_bytes=_VMEM_LIMIT),
        cost_estimate=pl.CostEstimate(
            flops=int(2 * N * L * Cin * Cout),
            transcendentals=0,
            bytes_accessed=int(N * Cin * L * 2 + Cout * Cin * 2 + Cout * 4
                               + N * Cout * L * out_isz)),
    )(x_b, w_f, b_f)


# -----------------------------------------------------------------------------
# Kernel 2: batched matmul (no bias) for the Relation tensor
# -----------------------------------------------------------------------------
def _bmm_kernel(l_ref, r_ref, o_ref):
    o_ref[0] = jnp.dot(l_ref[0], r_ref[0],
                       preferred_element_type=jnp.float32).astype(o_ref.dtype)


def relation_bmm(lhs, rhs, out_dtype=jnp.bfloat16):
    """(G, M, K) @ (G, K, N) -> (G, M, N); bf16 operands, f32 MXU accumulation."""
    G, M, K = lhs.shape
    N = rhs.shape[2]
    lhs_b = lhs.astype(jnp.bfloat16)
    rhs_b = rhs.astype(jnp.bfloat16)
    out_isz = jnp.dtype(out_dtype).itemsize
    fixed = M * K * 2                                  # lhs tile (invariant along lane axis)
    per_lane = K * 2 + M * out_isz
    Nb = _pick_lane_block(N, per_lane, fixed, _min_lane_blocks(G))
    grid = (G, N // Nb)

    return pl.pallas_call(
        _bmm_kernel,
        out_shape=jax.ShapeDtypeStruct((G, M, N), out_dtype),
        grid=grid,
        in_specs=[
            pl.BlockSpec((1, M, K), lambda g, j: (g, 0, 0)),
            pl.BlockSpec((1, K, Nb), lambda g, j: (g, 0, j)),
        ],
        out_specs=pl.BlockSpec((1, M, Nb), lambda g, j: (g, 0, j)),
        compiler_params=pltpu.CompilerParams(
            dimension_semantics=("parallel", "parallel"),
            vmem_limit_bytes=_VMEM_LIMIT),
        cost_estimate=pl.CostEstimate(
            flops=int(2 * G * M * K * N),
            transcendentals=0,
            bytes_accessed=int(G * (M * K + K * N) * 2 + G * M * N * out_isz)),
    )(lhs_b, rhs_b)


# -----------------------------------------------------------------------------
# Kernel 3: fused W_theta conv + BN + ReLU + softmax(dim=-1) + weighted readout
#   A = relu(bn(W_theta [x1; Rel_psi]))  ;  V = sum(softmax(A, -1) * F_all, -1)
# A, cat([x1, Rel_psi]) and the F_all permute never touch HBM.
# -----------------------------------------------------------------------------
def _theta_softmax_kernel(x1_ref, rel_ref, f_ref, w1_ref, w2_ref, b_ref,
                          v_ref, m_sc, l_sc, acc_sc):
    u = pl.program_id(2)

    @pl.when(u == 0)
    def _init():
        m_sc[...] = jnp.full(m_sc.shape, -jnp.inf, dtype=m_sc.dtype)
        l_sc[...] = jnp.zeros(l_sc.shape, dtype=l_sc.dtype)
        acc_sc[...] = jnp.zeros(acc_sc.shape, dtype=acc_sc.dtype)

    tb = x1_ref.shape[1]
    if tb == 1:
        x1 = x1_ref[0, 0]                                        # (c_red, HW)
        f = f_ref[0, 0].astype(jnp.float32)                      # (Cb, HW)
    else:
        # gather the tb frames into lane-dense (Cin, tb*HW) slabs
        x1 = jnp.concatenate([x1_ref[0, t] for t in range(tb)], axis=-1)
        f = jnp.concatenate([f_ref[0, t] for t in range(tb)],
                            axis=-1).astype(jnp.float32)         # (Cb, tb*HW)

    # folded W_theta conv + BN + ReLU on this lane slab (f32 MXU accumulation)
    a = jnp.dot(w1_ref[...], x1, preferred_element_type=jnp.float32)
    a = a + jnp.dot(w2_ref[...], rel_ref[0], preferred_element_type=jnp.float32)
    a = jnp.maximum(a + b_ref[...], 0.0)                         # (Cb, tb*HW)

    # online softmax over THW, fused with the weighted-sum readout
    m_prev = m_sc[...]
    m_new = jnp.maximum(m_prev, jnp.max(a, axis=-1, keepdims=True))
    alpha = jnp.exp(m_prev - m_new)
    p = jnp.exp(a - m_new)
    l_sc[...] = alpha * l_sc[...] + jnp.sum(p, axis=-1, keepdims=True)
    acc_sc[...] = alpha * acc_sc[...] + jnp.sum(p * f, axis=-1, keepdims=True)
    m_sc[...] = m_new

    @pl.when(u == pl.num_programs(2) - 1)
    def _finish():
        # exact divide: no approx-reciprocal error in the model output
        v_ref[0] = acc_sc[...] / l_sc[...]


def theta_softmax_readout(x1_4, rel, x4, w1_f, w2_f, b_f):
    """x1_4: (b,T,c_red,HW), rel: (b,d_red,THW), x4: (b,T,C,HW) -> V (b, C)."""
    b, T, c_red, HW = x1_4.shape
    d_red = rel.shape[1]
    C = w1_f.shape[0]
    THW = T * HW
    Tb, Cb = _theta_tiles(b, T, HW, C, c_red, d_red)
    grid = (b, C // Cb, T // Tb)

    out = pl.pallas_call(
        _theta_softmax_kernel,
        out_shape=jax.ShapeDtypeStruct((b, C, 1), jnp.float32),
        grid=grid,
        in_specs=[
            pl.BlockSpec((1, Tb, c_red, HW), lambda bi, ci, u: (bi, u, 0, 0)),
            pl.BlockSpec((1, d_red, Tb * HW), lambda bi, ci, u: (bi, 0, u)),
            pl.BlockSpec((1, Tb, Cb, HW), lambda bi, ci, u: (bi, u, ci, 0)),
            pl.BlockSpec((Cb, c_red), lambda bi, ci, u: (ci, 0)),
            pl.BlockSpec((Cb, d_red), lambda bi, ci, u: (ci, 0)),
            pl.BlockSpec((Cb, 1), lambda bi, ci, u: (ci, 0)),
        ],
        out_specs=pl.BlockSpec((1, Cb, 1), lambda bi, ci, u: (bi, ci, 0)),
        scratch_shapes=[pltpu.VMEM((Cb, 1), jnp.float32)] * 3,
        compiler_params=pltpu.CompilerParams(
            dimension_semantics=("parallel", "parallel", "arbitrary"),
            vmem_limit_bytes=_VMEM_LIMIT),
        cost_estimate=pl.CostEstimate(
            flops=int(2 * b * THW * C * (c_red + d_red) + 8 * b * C * THW),
            transcendentals=int(2 * b * C * THW),
            bytes_accessed=int(b * THW * 2 * (c_red + d_red + C)
                               + C * (c_red + d_red) * 2 + 8 * C + 4 * b * C)),
    )(x1_4.astype(jnp.bfloat16), rel.astype(jnp.bfloat16),
      x4.astype(jnp.bfloat16), w1_f, w2_f, b_f)
    return out[:, :, 0]                                          # (b, C)


# -----------------------------------------------------------------------------
# Model
# -----------------------------------------------------------------------------
def init_params(key, num_feature, D, s):
    c_red = num_feature // s
    d_red = D // s
    ks = jax.random.split(key, 10)

    def w(k, shape):
        return 0.1 * jax.random.normal(k, shape, dtype=jnp.float32)

    return {
        "W_u": w(ks[0], (c_red, num_feature)), "b_u": w(ks[1], (c_red,)),
        "W_v": w(ks[2], (c_red, num_feature)), "b_v": w(ks[3], (c_red,)),
        "W_phi": w(ks[4], (c_red, num_feature)), "b_phi": w(ks[5], (c_red,)),
        "W_psi": w(ks[6], (d_red, D)), "b_psi": w(ks[7], (d_red,)),
        "W_theta": w(ks[8], (num_feature, d_red + c_red)),
        "b_theta": w(ks[9], (num_feature,)),
        # BatchNorm affine params (PyTorch defaults)
        "g_u": jnp.ones((c_red,)), "be_u": jnp.zeros((c_red,)),
        "g_v": jnp.ones((c_red,)), "be_v": jnp.zeros((c_red,)),
        "g_phi": jnp.ones((c_red,)), "be_phi": jnp.zeros((c_red,)),
        "g_psi": jnp.ones((d_red,)), "be_psi": jnp.zeros((d_red,)),
        "g_theta": jnp.ones((num_feature,)), "be_theta": jnp.zeros((num_feature,)),
    }


def forward(x, p):
    B, C, H, W = x.shape
    T = 8
    b = B // T
    HW = H * W
    THW = T * HW
    c_red = p["W_u"].shape[0]          # num_feature / s
    d_red = p["W_psi"].shape[0]        # D / s
    s = C // c_red

    x3 = x.reshape(B, C, HW)           # free view of NCHW
    x_bf = x3.astype(jnp.bfloat16)     # shared bf16 operand copy
    x4_bf = x_bf.reshape(b, T, C, HW)  # free view (frame-major)

    # Input stats (bf16 read, f32 accumulation); shared by W_u / W_phi folds.
    mean_all, cov_all = _channel_stats(x_bf)
    F_R = jnp.mean(x.reshape(b, T, C, HW), axis=1)               # (b, C, HW) f32
    mean_R, cov_R = _channel_stats(F_R)

    # Fused conv1x1 + BN + ReLU (Pallas), natural NCL layouts.
    F_all_u = conv1x1_bn_relu(x_bf, p["W_u"], p["b_u"], p["g_u"], p["be_u"],
                              mean_all, cov_all)                 # (B, c_red, HW)
    x1 = conv1x1_bn_relu(x_bf, p["W_phi"], p["b_phi"], p["g_phi"], p["be_phi"],
                         mean_all, cov_all)                      # (B, c_red, HW)
    F_R_v = conv1x1_bn_relu(F_R, p["W_v"], p["b_v"], p["g_v"], p["be_v"],
                            mean_R, cov_R)                       # (b, c_red, HW)

    # Relation, emitted directly in the (b, HW, THW) layout the W_psi conv wants.
    lhs = jnp.transpose(F_R_v, (0, 2, 1))                        # (b, HW, c_red) (small)
    # TODO(synk): the reference's view(b,T,C,-1).permute(...) interleaves channel
    # and spatial indices element-wise; it is not a rectangular block mapping, so
    # it cannot be folded into the conv's out_spec index_map and stays a small
    # XLA reshape/transpose on the (B, c_red, HW) bf16 tensor.
    X = HW // s
    tmp = F_all_u.reshape(b, T, C, X)
    tmp = jnp.transpose(tmp, (0, 1, 3, 2)).reshape(b, T, X, s, c_red)
    rhs = jnp.transpose(tmp, (0, 4, 1, 2, 3)).reshape(b, c_red, THW)
    Relation = relation_bmm(lhs, rhs)                            # (b, HW, THW) bf16

    # W_psi Conv1d on Relation (channels = D = H*W).
    mean_rel, cov_rel = _channel_stats(Relation)
    Rel_psi = conv1x1_bn_relu(Relation, p["W_psi"], p["b_psi"],
                              p["g_psi"], p["be_psi"], mean_rel, cov_rel)  # (b, d_red, THW)

    # Fused W_theta conv + BN + ReLU + softmax + readout.
    # cat([x1, Rel_psi]) is never materialized: its joint (mean, cov) is assembled
    # from per-part stats plus the cross-covariance, so the BN fold stays exact.
    mean_x1, cov_x1 = _channel_stats(x1)
    mean_rp, cov_rp = _channel_stats(Rel_psi)
    x1_4 = x1.reshape(b, T, c_red, HW)                           # free view
    rp_4 = Rel_psi.reshape(b, d_red, T, HW)                      # free view
    cross = (jnp.einsum('btcl,bdtl->cd', x1_4, rp_4,
                        preferred_element_type=jnp.float32) / (b * THW)
             - jnp.outer(mean_x1, mean_rp))
    mean_cat = jnp.concatenate([mean_x1, mean_rp])
    cov_cat = jnp.block([[cov_x1, cross], [cross.T, cov_rp]])
    w_f, b_f = _fold_bn(p["W_theta"], p["b_theta"], p["g_theta"], p["be_theta"],
                        mean_cat, cov_cat)
    V = theta_softmax_readout(x1_4, Rel_psi, x4_bf,
                              w_f[:, :c_red], w_f[:, c_red:], b_f)  # (b, C)
    return V


if __name__ == "__main__":
    # Small shapes consistent with the module: T=8 frames (B = b*8), and the
    # Conv1d input-channel count D must equal H*W for forward() to typecheck.
    s = 2
    num_feature = 8          # C
    H = W = 4
    D = H * W                # 16
    b = 2
    B = b * 8                # 16

    key = jax.random.PRNGKey(0)
    kx, kp = jax.random.split(key)
    x = jax.random.normal(kx, (B, num_feature, H, W), dtype=jnp.float32)
    params = init_params(kp, num_feature, D, s)

    V = jax.jit(forward)(x, params)
    V = jax.block_until_ready(V)
    assert V.shape == (b, num_feature), V.shape
    assert bool(jnp.all(jnp.isfinite(V)))
    print("KERNEL_OK")
</pallas_src>

<mosaic_0001>
module attributes {stable_mosaic.version = 11 : i64} {
  func.func @_conv_bn_relu_kernel(%arg0: i32, %arg1: i32, %arg2: memref<1x8x16xbf16, #tpu.memory_space<vmem>>, %arg3: memref<4x8xbf16, #tpu.memory_space<vmem>>, %arg4: memref<4x1xf32, #tpu.memory_space<vmem>>, %arg5: memref<1x4x16xbf16, #tpu.memory_space<vmem>>) attributes {dimension_semantics = [#tpu.dimension_semantics<parallel>, #tpu.dimension_semantics<parallel>], iteration_bounds = array<i64: 16, 1>, scalar_prefetch = 0 : i64, scratch_operands = 0 : i64, tpu.core_type = #tpu.core_type<tc>, window_params = [{transform_indices = @transform_0, window_bounds = array<i64: 1, 8, 16>}, {pipeline_mode = #tpu.pipeline_mode<synchronous>, transform_indices = @transform_1, window_bounds = array<i64: 4, 8>}, {pipeline_mode = #tpu.pipeline_mode<synchronous>, transform_indices = @transform_2, window_bounds = array<i64: 4, 1>}, {transform_indices = @transform_3, window_bounds = array<i64: 1, 4, 16>}]} {
    %c0 = arith.constant 0 : index
    %c0_0 = arith.constant 0 : index
    %0 = vector.load %arg3[%c0, %c0_0] : memref<4x8xbf16, #tpu.memory_space<vmem>>, vector<4x8xbf16>
    %c0_1 = arith.constant 0 : index
    %c0_2 = arith.constant 0 : index
    %c0_3 = arith.constant 0 : index
    %1 = vector.load %arg2[%c0_1, %c0_2, %c0_3] : memref<1x8x16xbf16, #tpu.memory_space<vmem>>, vector<1x8x16xbf16>
    %2 = vector.shape_cast %1 : vector<1x8x16xbf16> to vector<8x16xbf16>
    %cst = arith.constant dense<0.000000e+00> : vector<4x16xf32>
    %3 = tpu.matmul %0, %2, %cst {dimension_numbers = #tpu.dot_dimension_numbers<[1], [0], [0], [1], [0, 0, 1, 1], [], []>} : vector<4x8xbf16>, vector<8x16xbf16>, vector<4x16xf32> -> vector<4x16xf32>
    %c0_4 = arith.constant 0 : index
    %c0_5 = arith.constant 0 : index
    %4 = vector.load %arg4[%c0_4, %c0_5] : memref<4x1xf32, #tpu.memory_space<vmem>>, vector<4x1xf32>
    %5 = vector.broadcast %4 : vector<4x1xf32> to vector<4x16xf32>
    %6 = arith.addf %3, %5 : vector<4x16xf32>
    %cst_6 = arith.constant 0.000000e+00 : f32
    %7 = vector.broadcast %cst_6 : f32 to vector<4x16xf32>
    %8 = arith.maximumf %6, %7 : vector<4x16xf32>
    %9 = arith.truncf %8 : vector<4x16xf32> to vector<4x16xbf16>
    %c0_7 = arith.constant 0 : index
    %c0_8 = arith.constant 0 : index
    %c0_9 = arith.constant 0 : index
    %10 = vector.load %arg5[%c0_7, %c0_8, %c0_9] : memref<1x4x16xbf16, #tpu.memory_space<vmem>>, vector<1x4x16xbf16>
    %11 = vector.shape_cast %10 : vector<1x4x16xbf16> to vector<4x16xbf16>
    %12 = vector.shape_cast %9 : vector<4x16xbf16> to vector<1x4x16xbf16>
    tpu.vector_store %arg5[%c0_7, %c0_8, %c0_9], %12 {strides = array<i32>} : memref<1x4x16xbf16, #tpu.memory_space<vmem>>, vector<1x4x16xbf16>,
    return
  }
  func.func @transform_0(%arg0: i32, %arg1: i32) -> (i32, i32, i32) {
    %c0_i32 = arith.constant 0 : i32
    %c0_i32_0 = arith.constant 0 : i32
    return %arg0, %c0_i32, %arg1 : i32, i32, i32
  }
  func.func @transform_1(%arg0: i32, %arg1: i32) -> (i32, i32) {
    %c0_i32 = arith.constant 0 : i32
    %c0_i32_0 = arith.constant 0 : i32
    %c0_i32_1 = arith.constant 0 : i32
    return %c0_i32, %c0_i32_0 : i32, i32
  }
  func.func @transform_2(%arg0: i32, %arg1: i32) -> (i32, i32) {
    %c0_i32 = arith.constant 0 : i32
    %c0_i32_0 = arith.constant 0 : i32
    %c0_i32_1 = arith.constant 0 : i32
    return %c0_i32, %c0_i32_0 : i32, i32
  }
  func.func @transform_3(%arg0: i32, %arg1: i32) -> (i32, i32, i32) {
    %c0_i32 = arith.constant 0 : i32
    %c0_i32_0 = arith.constant 0 : i32
    return %arg0, %c0_i32, %arg1 : i32, i32, i32
  }
}

module attributes {stable_mosaic.version = 11 : i64} {
  func.func @_conv_bn_relu_kernel(%arg0: i32, %arg1: i32, %arg2: memref<1x8x16xbf16, #tpu.memory_space<vmem>>, %arg3: memref<4x8xbf16, #tpu.memory_space<vmem>>, %arg4: memref<4x1xf32, #tpu.memory_space<vmem>>, %arg5: memref<1x4x16xbf16, #tpu.memory_space<vmem>>) attributes {dimension_semantics = [#tpu.dimension_semantics<parallel>, #tpu.dimension_semantics<parallel>], iteration_bounds = array<i64: 2, 1>, scalar_prefetch = 0 : i64, scratch_operands = 0 : i64, tpu.core_type = #tpu.core_type<tc>, window_params = [{transform_indices = @transform_0, window_bounds = array<i64: 1, 8, 16>}, {pipeline_mode = #tpu.pipeline_mode<synchronous>, transform_indices = @transform_1, window_bounds = array<i64: 4, 8>}, {pipeline_mode = #tpu.pipeline_mode<synchronous>, transform_indices = @transform_2, window_bounds = array<i64: 4, 1>}, {transform_indices = @transform_3, window_bounds = array<i64: 1, 4, 16>}]} {
    %c0 = arith.constant 0 : index
    %c0_0 = arith.constant 0 : index
    %0 = vector.load %arg3[%c0, %c0_0] : memref<4x8xbf16, #tpu.memory_space<vmem>>, vector<4x8xbf16>
    %c0_1 = arith.constant 0 : index
    %c0_2 = arith.constant 0 : index
    %c0_3 = arith.constant 0 : index
    %1 = vector.load %arg2[%c0_1, %c0_2, %c0_3] : memref<1x8x16xbf16, #tpu.memory_space<vmem>>, vector<1x8x16xbf16>
    %2 = vector.shape_cast %1 : vector<1x8x16xbf16> to vector<8x16xbf16>
    %cst = arith.constant dense<0.000000e+00> : vector<4x16xf32>
    %3 = tpu.matmul %0, %2, %cst {dimension_numbers = #tpu.dot_dimension_numbers<[1], [0], [0], [1], [0, 0, 1, 1], [], []>} : vector<4x8xbf16>, vector<8x16xbf16>, vector<4x16xf32> -> vector<4x16xf32>
    %c0_4 = arith.constant 0 : index
    %c0_5 = arith.constant 0 : index
    %4 = vector.load %arg4[%c0_4, %c0_5] : memref<4x1xf32, #tpu.memory_space<vmem>>, vector<4x1xf32>
    %5 = vector.broadcast %4 : vector<4x1xf32> to vector<4x16xf32>
    %6 = arith.addf %3, %5 : vector<4x16xf32>
    %cst_6 = arith.constant 0.000000e+00 : f32
    %7 = vector.broadcast %cst_6 : f32 to vector<4x16xf32>
    %8 = arith.maximumf %6, %7 : vector<4x16xf32>
    %9 = arith.truncf %8 : vector<4x16xf32> to vector<4x16xbf16>
    %c0_7 = arith.constant 0 : index
    %c0_8 = arith.constant 0 : index
    %c0_9 = arith.constant 0 : index
    %10 = vector.load %arg5[%c0_7, %c0_8, %c0_9] : memref<1x4x16xbf16, #tpu.memory_space<vmem>>, vector<1x4x16xbf16>
    %11 = vector.shape_cast %10 : vector<1x4x16xbf16> to vector<4x16xbf16>
    %12 = vector.shape_cast %9 : vector<4x16xbf16> to vector<1x4x16xbf16>
    tpu.vector_store %arg5[%c0_7, %c0_8, %c0_9], %12 {strides = array<i32>} : memref<1x4x16xbf16, #tpu.memory_space<vmem>>, vector<1x4x16xbf16>,
    return
  }
  func.func @transform_0(%arg0: i32, %arg1: i32) -> (i32, i32, i32) {
    %c0_i32 = arith.constant 0 : i32
    %c0_i32_0 = arith.constant 0 : i32
    return %arg0, %c0_i32, %arg1 : i32, i32, i32
  }
  func.func @transform_1(%arg0: i32, %arg1: i32) -> (i32, i32) {
    %c0_i32 = arith.constant 0 : i32
    %c0_i32_0 = arith.constant 0 : i32
    %c0_i32_1 = arith.constant 0 : i32
    return %c0_i32, %c0_i32_0 : i32, i32
  }
  func.func @transform_2(%arg0: i32, %arg1: i32) -> (i32, i32) {
    %c0_i32 = arith.constant 0 : i32
    %c0_i32_0 = arith.constant 0 : i32
    %c0_i32_1 = arith.constant 0 : i32
    return %c0_i32, %c0_i32_0 : i32, i32
  }
  func.func @transform_3(%arg0: i32, %arg1: i32) -> (i32, i32, i32) {
    %c0_i32 = arith.constant 0 : i32
    %c0_i32_0 = arith.constant 0 : i32
    return %arg0, %c0_i32, %arg1 : i32, i32, i32
  }
}

module attributes {stable_mosaic.version = 11 : i64} {
  func.func @_bmm_kernel(%arg0: i32, %arg1: i32, %arg2: memref<1x16x4xbf16, #tpu.memory_space<vmem>>, %arg3: memref<1x4x128xbf16, #tpu.memory_space<vmem>>, %arg4: memref<1x16x128xbf16, #tpu.memory_space<vmem>>) attributes {dimension_semantics = [#tpu.dimension_semantics<parallel>, #tpu.dimension_semantics<parallel>], iteration_bounds = array<i64: 2, 1>, scalar_prefetch = 0 : i64, scratch_operands = 0 : i64, tpu.core_type = #tpu.core_type<tc>, window_params = [{transform_indices = @transform_0, window_bounds = array<i64: 1, 16, 4>}, {transform_indices = @transform_1, window_bounds = array<i64: 1, 4, 128>}, {transform_indices = @transform_2, window_bounds = array<i64: 1, 16, 128>}]} {
    %c0 = arith.constant 0 : index
    %c0_0 = arith.constant 0 : index
    %c0_1 = arith.constant 0 : index
    %0 = vector.load %arg2[%c0, %c0_0, %c0_1] : memref<1x16x4xbf16, #tpu.memory_space<vmem>>, vector<1x16x4xbf16>
    %1 = vector.shape_cast %0 : vector<1x16x4xbf16> to vector<16x4xbf16>
    %c0_2 = arith.constant 0 : index
    %c0_3 = arith.constant 0 : index
    %c0_4 = arith.constant 0 : index
    %2 = vector.load %arg3[%c0_2, %c0_3, %c0_4] : memref<1x4x128xbf16, #tpu.memory_space<vmem>>, vector<1x4x128xbf16>
    %3 = vector.shape_cast %2 : vector<1x4x128xbf16> to vector<4x128xbf16>
    %cst = arith.constant dense<0.000000e+00> : vector<16x128xf32>
    %4 = tpu.matmul %1, %3, %cst {dimension_numbers = #tpu.dot_dimension_numbers<[1], [0], [0], [1], [0, 0, 1, 1], [], []>} : vector<16x4xbf16>, vector<4x128xbf16>, vector<16x128xf32> -> vector<16x128xf32>
    %5 = arith.truncf %4 : vector<16x128xf32> to vector<16x128xbf16>
    %c0_5 = arith.constant 0 : index
    %c0_6 = arith.constant 0 : index
    %c0_7 = arith.constant 0 : index
    %6 = vector.load %arg4[%c0_5, %c0_6, %c0_7] : memref<1x16x128xbf16, #tpu.memory_space<vmem>>, vector<1x16x128xbf16>
    %7 = vector.shape_cast %6 : vector<1x16x128xbf16> to vector<16x128xbf16>
    %8 = vector.shape_cast %5 : vector<16x128xbf16> to vector<1x16x128xbf16>
    tpu.vector_store %arg4[%c0_5, %c0_6, %c0_7], %8 {strides = array<i32>} : memref<1x16x128xbf16, #tpu.memory_space<vmem>>, vector<1x16x128xbf16>,
    return
  }
  func.func @transform_0(%arg0: i32, %arg1: i32) -> (i32, i32, i32) {
    %c0_i32 = arith.constant 0 : i32
    %c0_i32_0 = arith.constant 0 : i32
    %c0_i32_1 = arith.constant 0 : i32
    return %arg0, %c0_i32, %c0_i32_0 : i32, i32, i32
  }
  func.func @transform_1(%arg0: i32, %arg1: i32) -> (i32, i32, i32) {
    %c0_i32 = arith.constant 0 : i32
    %c0_i32_0 = arith.constant 0 : i32
    return %arg0, %c0_i32, %arg1 : i32, i32, i32
  }
  func.func @transform_2(%arg0: i32, %arg1: i32) -> (i32, i32, i32) {
    %c0_i32 = arith.constant 0 : i32
    %c0_i32_0 = arith.constant 0 : i32
    return %arg0, %c0_i32, %arg1 : i32, i32, i32
  }
}

module attributes {stable_mosaic.version = 11 : i64} {
  func.func @_conv_bn_relu_kernel(%arg0: i32, %arg1: i32, %arg2: memref<1x16x128xbf16, #tpu.memory_space<vmem>>, %arg3: memref<8x16xbf16, #tpu.memory_space<vmem>>, %arg4: memref<8x1xf32, #tpu.memory_space<vmem>>, %arg5: memref<1x8x128xbf16, #tpu.memory_space<vmem>>) attributes {dimension_semantics = [#tpu.dimension_semantics<parallel>, #tpu.dimension_semantics<parallel>], iteration_bounds = array<i64: 2, 1>, scalar_prefetch = 0 : i64, scratch_operands = 0 : i64, tpu.core_type = #tpu.core_type<tc>, window_params = [{transform_indices = @transform_0, window_bounds = array<i64: 1, 16, 128>}, {pipeline_mode = #tpu.pipeline_mode<synchronous>, transform_indices = @transform_1, window_bounds = array<i64: 8, 16>}, {pipeline_mode = #tpu.pipeline_mode<synchronous>, transform_indices = @transform_2, window_bounds = array<i64: 8, 1>}, {transform_indices = @transform_3, window_bounds = array<i64: 1, 8, 128>}]} {
    %c0 = arith.constant 0 : index
    %c0_0 = arith.constant 0 : index
    %0 = vector.load %arg3[%c0, %c0_0] : memref<8x16xbf16, #tpu.memory_space<vmem>>, vector<8x16xbf16>
    %c0_1 = arith.constant 0 : index
    %c0_2 = arith.constant 0 : index
    %c0_3 = arith.constant 0 : index
    %1 = vector.load %arg2[%c0_1, %c0_2, %c0_3] : memref<1x16x128xbf16, #tpu.memory_space<vmem>>, vector<1x16x128xbf16>
    %2 = vector.shape_cast %1 : vector<1x16x128xbf16> to vector<16x128xbf16>
    %cst = arith.constant dense<0.000000e+00> : vector<8x128xf32>
    %3 = tpu.matmul %0, %2, %cst {dimension_numbers = #tpu.dot_dimension_numbers<[1], [0], [0], [1], [0, 0, 1, 1], [], []>} : vector<8x16xbf16>, vector<16x128xbf16>, vector<8x128xf32> -> vector<8x128xf32>
    %c0_4 = arith.constant 0 : index
    %c0_5 = arith.constant 0 : index
    %4 = vector.load %arg4[%c0_4, %c0_5] : memref<8x1xf32, #tpu.memory_space<vmem>>, vector<8x1xf32>
    %5 = vector.broadcast %4 : vector<8x1xf32> to vector<8x128xf32>
    %6 = arith.addf %3, %5 : vector<8x128xf32>
    %cst_6 = arith.constant 0.000000e+00 : f32
    %7 = vector.broadcast %cst_6 : f32 to vector<8x128xf32>
    %8 = arith.maximumf %6, %7 : vector<8x128xf32>
    %9 = arith.truncf %8 : vector<8x128xf32> to vector<8x128xbf16>
    %c0_7 = arith.constant 0 : index
    %c0_8 = arith.constant 0 : index
    %c0_9 = arith.constant 0 : index
    %10 = vector.load %arg5[%c0_7, %c0_8, %c0_9] : memref<1x8x128xbf16, #tpu.memory_space<vmem>>, vector<1x8x128xbf16>
    %11 = vector.shape_cast %10 : vector<1x8x128xbf16> to vector<8x128xbf16>
    %12 = vector.shape_cast %9 : vector<8x128xbf16> to vector<1x8x128xbf16>
    tpu.vector_store %arg5[%c0_7, %c0_8, %c0_9], %12 {strides = array<i32>} : memref<1x8x128xbf16, #tpu.memory_space<vmem>>, vector<1x8x128xbf16>,
    return
  }
  func.func @transform_0(%arg0: i32, %arg1: i32) -> (i32, i32, i32) {
    %c0_i32 = arith.constant 0 : i32
    %c0_i32_0 = arith.constant 0 : i32
    return %arg0, %c0_i32, %arg1 : i32, i32, i32
  }
  func.func @transform_1(%arg0: i32, %arg1: i32) -> (i32, i32) {
    %c0_i32 = arith.constant 0 : i32
    %c0_i32_0 = arith.constant 0 : i32
    %c0_i32_1 = arith.constant 0 : i32
    return %c0_i32, %c0_i32_0 : i32, i32
  }
  func.func @transform_2(%arg0: i32, %arg1: i32) -> (i32, i32) {
    %c0_i32 = arith.constant 0 : i32
    %c0_i32_0 = arith.constant 0 : i32
    %c0_i32_1 = arith.constant 0 : i32
    return %c0_i32, %c0_i32_0 : i32, i32
  }
  func.func @transform_3(%arg0: i32, %arg1: i32) -> (i32, i32, i32) {
    %c0_i32 = arith.constant 0 : i32
    %c0_i32_0 = arith.constant 0 : i32
    return %arg0, %c0_i32, %arg1 : i32, i32, i32
  }
}

module attributes {stable_mosaic.version = 11 : i64} {
  func.func @_theta_softmax_kernel(%arg0: i32, %arg1: i32, %arg2: i32, %arg3: memref<1x8x4x16xbf16, #tpu.memory_space<vmem>>, %arg4: memref<1x8x128xbf16, #tpu.memory_space<vmem>>, %arg5: memref<1x8x8x16xbf16, #tpu.memory_space<vmem>>, %arg6: memref<8x4xbf16, #tpu.memory_space<vmem>>, %arg7: memref<8x8xbf16, #tpu.memory_space<vmem>>, %arg8: memref<8x1xf32, #tpu.memory_space<vmem>>, %arg9: memref<1x8x1xf32, #tpu.memory_space<vmem>>, %arg10: memref<8x1xf32, #tpu.memory_space<vmem>>, %arg11: memref<8x1xf32, #tpu.memory_space<vmem>>, %arg12: memref<8x1xf32, #tpu.memory_space<vmem>>) attributes {dimension_semantics = [#tpu.dimension_semantics<parallel>, #tpu.dimension_semantics<parallel>, #tpu.dimension_semantics<arbitrary>], iteration_bounds = array<i64: 2, 1, 1>, scalar_prefetch = 0 : i64, scratch_operands = 3 : i64, tpu.core_type = #tpu.core_type<tc>, window_params = [{transform_indices = @transform_0, window_bounds = array<i64: 1, 8, 4, 16>}, {transform_indices = @transform_1, window_bounds = array<i64: 1, 8, 128>}, {transform_indices = @transform_2, window_bounds = array<i64: 1, 8, 8, 16>}, {transform_indices = @transform_3, window_bounds = array<i64: 8, 4>}, {transform_indices = @transform_4, window_bounds = array<i64: 8, 8>}, {transform_indices = @transform_5, window_bounds = array<i64: 8, 1>}, {transform_indices = @transform_6, window_bounds = array<i64: 1, 8, 1>}]} {
    %c0_i32 = arith.constant 0 : i32
    %0 = arith.cmpi eq, %arg2, %c0_i32 : i32
    %1 = arith.extui %0 : i1 to i32
    %c0_i32_0 = arith.constant 0 : i32
    %2 = arith.cmpi ne, %1, %c0_i32_0 : i32
    scf.if %2 {
      %cst_85 = arith.constant 0xFF800000 : f32
      %76 = vector.broadcast %cst_85 : f32 to vector<8x1xf32>
      %c0_86 = arith.constant 0 : index
      %c0_87 = arith.constant 0 : index
      %77 = vector.load %arg10[%c0_86, %c0_87] : memref<8x1xf32, #tpu.memory_space<vmem>>, vector<8x1xf32>
      tpu.vector_store %arg10[%c0_86, %c0_87], %76 {strides = array<i32>} : memref<8x1xf32, #tpu.memory_space<vmem>>, vector<8x1xf32>,
      %cst_88 = arith.constant 0.000000e+00 : f32
      %78 = vector.broadcast %cst_88 : f32 to vector<8x1xf32>
      %c0_89 = arith.constant 0 : index
      %c0_90 = arith.constant 0 : index
      %79 = vector.load %arg11[%c0_89, %c0_90] : memref<8x1xf32, #tpu.memory_space<vmem>>, vector<8x1xf32>
      tpu.vector_store %arg11[%c0_89, %c0_90], %78 {strides = array<i32>} : memref<8x1xf32, #tpu.memory_space<vmem>>, vector<8x1xf32>,
      %cst_91 = arith.constant 0.000000e+00 : f32
      %80 = vector.broadcast %cst_91 : f32 to vector<8x1xf32>
      %c0_92 = arith.constant 0 : index
      %c0_93 = arith.constant 0 : index
      %81 = vector.load %arg12[%c0_92, %c0_93] : memref<8x1xf32, #tpu.memory_space<vmem>>, vector<8x1xf32>
      tpu.vector_store %arg12[%c0_92, %c0_93], %80 {strides = array<i32>} : memref<8x1xf32, #tpu.memory_space<vmem>>, vector<8x1xf32>,
    } else {
    }
    %c0 = arith.constant 0 : index
    %c0_1 = arith.constant 0 : index
    %c0_2 = arith.constant 0 : index
    %c0_3 = arith.constant 0 : index
    %3 = vector.load %arg3[%c0, %c0_1, %c0_2, %c0_3] : memref<1x8x4x16xbf16, #tpu.memory_space<vmem>>, vector<1x1x4x16xbf16>
    %4 = vector.shape_cast %3 : vector<1x1x4x16xbf16> to vector<4x16xbf16>
    %c0_4 = arith.constant 0 : index
    %c1 = arith.constant 1 : index
    %c0_5 = arith.constant 0 : index
    %c0_6 = arith.constant 0 : index
    %5 = vector.load %arg3[%c0_4, %c1, %c0_5, %c0_6] : memref<1x8x4x16xbf16, #tpu.memory_space<vmem>>, vector<1x1x4x16xbf16>
    %6 = vector.shape_cast %5 : vector<1x1x4x16xbf16> to vector<4x16xbf16>
    %c0_7 = arith.constant 0 : index
    %c2 = arith.constant 2 : index
    %c0_8 = arith.constant 0 : index
    %c0_9 = arith.constant 0 : index
    %7 = vector.load %arg3[%c0_7, %c2, %c0_8, %c0_9] : memref<1x8x4x16xbf16, #tpu.memory_space<vmem>>, vector<1x1x4x16xbf16>
    %8 = vector.shape_cast %7 : vector<1x1x4x16xbf16> to vector<4x16xbf16>
    %c0_10 = arith.constant 0 : index
    %c3 = arith.constant 3 : index
    %c0_11 = arith.constant 0 : index
    %c0_12 = arith.constant 0 : index
    %9 = vector.load %arg3[%c0_10, %c3, %c0_11, %c0_12] : memref<1x8x4x16xbf16, #tpu.memory_space<vmem>>, vector<1x1x4x16xbf16>
    %10 = vector.shape_cast %9 : vector<1x1x4x16xbf16> to vector<4x16xbf16>
    %c0_13 = arith.constant 0 : index
    %c4 = arith.constant 4 : index
    %c0_14 = arith.constant 0 : index
    %c0_15 = arith.constant 0 : index
    %11 = vector.load %arg3[%c0_13, %c4, %c0_14, %c0_15] : memref<1x8x4x16xbf16, #tpu.memory_space<vmem>>, vector<1x1x4x16xbf16>
    %12 = vector.shape_cast %11 : vector<1x1x4x16xbf16> to vector<4x16xbf16>
    %c0_16 = arith.constant 0 : index
    %c5 = arith.constant 5 : index
    %c0_17 = arith.constant 0 : index
    %c0_18 = arith.constant 0 : index
    %13 = vector.load %arg3[%c0_16, %c5, %c0_17, %c0_18] : memref<1x8x4x16xbf16, #tpu.memory_space<vmem>>, vector<1x1x4x16xbf16>
    %14 = vector.shape_cast %13 : vector<1x1x4x16xbf16> to vector<4x16xbf16>
    %c0_19 = arith.constant 0 : index
    %c6 = arith.constant 6 : index
    %c0_20 = arith.constant 0 : index
    %c0_21 = arith.constant 0 : index
    %15 = vector.load %arg3[%c0_19, %c6, %c0_20, %c0_21] : memref<1x8x4x16xbf16, #tpu.memory_space<vmem>>, vector<1x1x4x16xbf16>
    %16 = vector.shape_cast %15 : vector<1x1x4x16xbf16> to vector<4x16xbf16>
    %c0_22 = arith.constant 0 : index
    %c7 = arith.constant 7 : index
    %c0_23 = arith.constant 0 : index
    %c0_24 = arith.constant 0 : index
    %17 = vector.load %arg3[%c0_22, %c7, %c0_23, %c0_24] : memref<1x8x4x16xbf16, #tpu.memory_space<vmem>>, vector<1x1x4x16xbf16>
    %18 = vector.shape_cast %17 : vector<1x1x4x16xbf16> to vector<4x16xbf16>
    %19 = tpu.concatenate %4, %6, %8, %10, %12, %14, %16, %18 in 1 : vector<4x16xbf16>, vector<4x16xbf16>, vector<4x16xbf16>, vector<4x16xbf16>, vector<4x16xbf16>, vector<4x16xbf16>, vector<4x16xbf16>, vector<4x16xbf16> -> vector<4x128xbf16>
    %c0_25 = arith.constant 0 : index
    %c0_26 = arith.constant 0 : index
    %c0_27 = arith.constant 0 : index
    %c0_28 = arith.constant 0 : index
    %20 = vector.load %arg5[%c0_25, %c0_26, %c0_27, %c0_28] : memref<1x8x8x16xbf16, #tpu.memory_space<vmem>>, vector<1x1x8x16xbf16>
    %21 = vector.shape_cast %20 : vector<1x1x8x16xbf16> to vector<8x16xbf16>
    %c0_29 = arith.constant 0 : index
    %c1_30 = arith.constant 1 : index
    %c0_31 = arith.constant 0 : index
    %c0_32 = arith.constant 0 : index
    %22 = vector.load %arg5[%c0_29, %c1_30, %c0_31, %c0_32] : memref<1x8x8x16xbf16, #tpu.memory_space<vmem>>, vector<1x1x8x16xbf16>
    %23 = vector.shape_cast %22 : vector<1x1x8x16xbf16> to vector<8x16xbf16>
    %c0_33 = arith.constant 0 : index
    %c2_34 = arith.constant 2 : index
    %c0_35 = arith.constant 0 : index
    %c0_36 = arith.constant 0 : index
    %24 = vector.load %arg5[%c0_33, %c2_34, %c0_35, %c0_36] : memref<1x8x8x16xbf16, #tpu.memory_space<vmem>>, vector<1x1x8x16xbf16>
    %25 = vector.shape_cast %24 : vector<1x1x8x16xbf16> to vector<8x16xbf16>
    %c0_37 = arith.constant 0 : index
    %c3_38 = arith.constant 3 : index
    %c0_39 = arith.constant 0 : index
    %c0_40 = arith.constant 0 : index
    %26 = vector.load %arg5[%c0_37, %c3_38, %c0_39, %c0_40] : memref<1x8x8x16xbf16, #tpu.memory_space<vmem>>, vector<1x1x8x16xbf16>
    %27 = vector.shape_cast %26 : vector<1x1x8x16xbf16> to vector<8x16xbf16>
    %c0_41 = arith.constant 0 : index
    %c4_42 = arith.constant 4 : index
    %c0_43 = arith.constant 0 : index
    %c0_44 = arith.constant 0 : index
    %28 = vector.load %arg5[%c0_41, %c4_42, %c0_43, %c0_44] : memref<1x8x8x16xbf16, #tpu.memory_space<vmem>>, vector<1x1x8x16xbf16>
    %29 = vector.shape_cast %28 : vector<1x1x8x16xbf16> to vector<8x16xbf16>
    %c0_45 = arith.constant 0 : index
    %c5_46 = arith.constant 5 : index
    %c0_47 = arith.constant 0 : index
    %c0_48 = arith.constant 0 : index
    %30 = vector.load %arg5[%c0_45, %c5_46, %c0_47, %c0_48] : memref<1x8x8x16xbf16, #tpu.memory_space<vmem>>, vector<1x1x8x16xbf16>
    %31 = vector.shape_cast %30 : vector<1x1x8x16xbf16> to vector<8x16xbf16>
    %c0_49 = arith.constant 0 : index
    %c6_50 = arith.constant 6 : index
    %c0_51 = arith.constant 0 : index
    %c0_52 = arith.constant 0 : index
    %32 = vector.load %arg5[%c0_49, %c6_50, %c0_51, %c0_52] : memref<1x8x8x16xbf16, #tpu.memory_space<vmem>>, vector<1x1x8x16xbf16>
    %33 = vector.shape_cast %32 : vector<1x1x8x16xbf16> to vector<8x16xbf16>
    %c0_53 = arith.constant 0 : index
    %c7_54 = arith.constant 7 : index
    %c0_55 = arith.constant 0 : index
    %c0_56 = arith.constant 0 : index
    %34 = vector.load %arg5[%c0_53, %c7_54, %c0_55, %c0_56] : memref<1x8x8x16xbf16, #tpu.memory_space<vmem>>, vector<1x1x8x16xbf16>
    %35 = vector.shape_cast %34 : vector<1x1x8x16xbf16> to vector<8x16xbf16>
    %36 = tpu.concatenate %21, %23, %25, %27, %29, %31, %33, %35 in 1 : vector<8x16xbf16>, vector<8x16xbf16>, vector<8x16xbf16>, vector<8x16xbf16>, vector<8x16xbf16>, vector<8x16xbf16>, vector<8x16xbf16>, vector<8x16xbf16> -> vector<8x128xbf16>
    %37 = arith.extf %36 : vector<8x128xbf16> to vector<8x128xf32>
    %c0_57 = arith.constant 0 : index
    %c0_58 = arith.constant 0 : index
    %38 = vector.load %arg6[%c0_57, %c0_58] : memref<8x4xbf16, #tpu.memory_space<vmem>>, vector<8x4xbf16>
    %cst = arith.constant dense<0.000000e+00> : vector<8x128xf32>
    %39 = tpu.matmul %38, %19, %cst {dimension_numbers = #tpu.dot_dimension_numbers<[1], [0], [0], [1], [0, 0, 1, 1], [], []>} : vector<8x4xbf16>, vector<4x128xbf16>, vector<8x128xf32> -> vector<8x128xf32>
    %c0_59 = arith.constant 0 : index
    %c0_60 = arith.constant 0 : index
    %40 = vector.load %arg7[%c0_59, %c0_60] : memref<8x8xbf16, #tpu.memory_space<vmem>>, vector<8x8xbf16>
    %c0_61 = arith.constant 0 : index
    %c0_62 = arith.constant 0 : index
    %c0_63 = arith.constant 0 : index
    %41 = vector.load %arg4[%c0_61, %c0_62, %c0_63] : memref<1x8x128xbf16, #tpu.memory_space<vmem>>, vector<1x8x128xbf16>
    %42 = vector.shape_cast %41 : vector<1x8x128xbf16> to vector<8x128xbf16>
    %cst_64 = arith.constant dense<0.000000e+00> : vector<8x128xf32>
    %43 = tpu.matmul %40, %42, %cst_64 {dimension_numbers = #tpu.dot_dimension_numbers<[1], [0], [0], [1], [0, 0, 1, 1], [], []>} : vector<8x8xbf16>, vector<8x128xbf16>, vector<8x128xf32> -> vector<8x128xf32>
    %44 = arith.addf %39, %43 : vector<8x128xf32>
    %c0_65 = arith.constant 0 : index
    %c0_66 = arith.constant 0 : index
    %45 = vector.load %arg8[%c0_65, %c0_66] : memref<8x1xf32, #tpu.memory_space<vmem>>, vector<8x1xf32>
    %46 = vector.broadcast %45 : vector<8x1xf32> to vector<8x128xf32>
    %47 = arith.addf %44, %46 : vector<8x128xf32>
    %cst_67 = arith.constant 0.000000e+00 : f32
    %48 = vector.broadcast %cst_67 : f32 to vector<8x128xf32>
    %49 = arith.maximumf %47, %48 : vector<8x128xf32>
    %c0_68 = arith.constant 0 : index
    %c0_69 = arith.constant 0 : index
    %50 = vector.load %arg10[%c0_68, %c0_69] : memref<8x1xf32, #tpu.memory_space<vmem>>, vector<8x1xf32>
    %cst_70 = arith.constant dense<0xFF800000> : vector<8xf32>
    %51 = vector.multi_reduction <maximumf>, %49, %cst_70 [1] : vector<8x128xf32> to vector<8xf32>
    %52 = vector.shape_cast %51 : vector<8xf32> to vector<8x1xf32>
    %53 = arith.maximumf %50, %52 : vector<8x1xf32>
    %54 = arith.subf %50, %53 : vector<8x1xf32>
    %55 = math.exp %54 : vector<8x1xf32>
    %56 = vector.broadcast %53 : vector<8x1xf32> to vector<8x128xf32>
    %57 = arith.subf %49, %56 : vector<8x128xf32>
    %58 = math.exp %57 : vector<8x128xf32>
    %c0_71 = arith.constant 0 : index
    %c0_72 = arith.constant 0 : index
    %59 = vector.load %arg11[%c0_71, %c0_72] : memref<8x1xf32, #tpu.memory_space<vmem>>, vector<8x1xf32>
    %60 = arith.mulf %55, %59 : vector<8x1xf32>
    %cst_73 = arith.constant dense<0.000000e+00> : vector<8xf32>
    %61 = vector.multi_reduction <add>, %58, %cst_73 [1] : vector<8x128xf32> to vector<8xf32>
    %62 = vector.shape_cast %61 : vector<8xf32> to vector<8x1xf32>
    %63 = arith.addf %60, %62 : vector<8x1xf32>
    %c0_74 = arith.constant 0 : index
    %c0_75 = arith.constant 0 : index
    %64 = vector.load %arg11[%c0_74, %c0_75] : memref<8x1xf32, #tpu.memory_space<vmem>>, vector<8x1xf32>
    tpu.vector_store %arg11[%c0_74, %c0_75], %63 {strides = array<i32>} : memref<8x1xf32, #tpu.memory_space<vmem>>, vector<8x1xf32>,
    %c0_76 = arith.constant 0 : index
    %c0_77 = arith.constant 0 : index
    %65 = vector.load %arg12[%c0_76, %c0_77] : memref<8x1xf32, #tpu.memory_space<vmem>>, vector<8x1xf32>
    %66 = arith.mulf %55, %65 : vector<8x1xf32>
    %67 = arith.mulf %58, %37 : vector<8x128xf32>
    %cst_78 = arith.constant dense<0.000000e+00> : vector<8xf32>
    %68 = vector.multi_reduction <add>, %67, %cst_78 [1] : vector<8x128xf32> to vector<8xf32>
    %69 = vector.shape_cast %68 : vector<8xf32> to vector<8x1xf32>
    %70 = arith.addf %66, %69 : vector<8x1xf32>
    %c0_79 = arith.constant 0 : index
    %c0_80 = arith.constant 0 : index
    %71 = vector.load %arg12[%c0_79, %c0_80] : memref<8x1xf32, #tpu.memory_space<vmem>>, vector<8x1xf32>
    tpu.vector_store %arg12[%c0_79, %c0_80], %70 {strides = array<i32>} : memref<8x1xf32, #tpu.memory_space<vmem>>, vector<8x1xf32>,
    %c0_81 = arith.constant 0 : index
    %c0_82 = arith.constant 0 : index
    %72 = vector.load %arg10[%c0_81, %c0_82] : memref<8x1xf32, #tpu.memory_space<vmem>>, vector<8x1xf32>
    tpu.vector_store %arg10[%c0_81, %c0_82], %53 {strides = array<i32>} : memref<8x1xf32, #tpu.memory_space<vmem>>, vector<8x1xf32>,
    %c0_i32_83 = arith.constant 0 : i32
    %73 = arith.cmpi eq, %arg2, %c0_i32_83 : i32
    %74 = arith.extui %73 : i1 to i32
    %c0_i32_84 = arith.constant 0 : i32
    %75 = arith.cmpi ne, %74, %c0_i32_84 : i32
    scf.if %75 {
      %c0_85 = arith.constant 0 : index
      %c0_86 = arith.constant 0 : index
      %76 = vector.load %arg12[%c0_85, %c0_86] : memref<8x1xf32, #tpu.memory_space<vmem>>, vector<8x1xf32>
      %c0_87 = arith.constant 0 : index
      %c0_88 = arith.constant 0 : index
      %77 = vector.load %arg11[%c0_87, %c0_88] : memref<8x1xf32, #tpu.memory_space<vmem>>, vector<8x1xf32>
      %78 = arith.divf %76, %77 : vector<8x1xf32>
      %c0_89 = arith.constant 0 : index
      %c0_90 = arith.constant 0 : index
      %c0_91 = arith.constant 0 : index
      %79 = vector.load %arg9[%c0_89, %c0_90, %c0_91] : memref<1x8x1xf32, #tpu.memory_space<vmem>>, vector<1x8x1xf32>
      %80 = vector.shape_cast %79 : vector<1x8x1xf32> to vector<8x1xf32>
      %81 = vector.shape_cast %78 : vector<8x1xf32> to vector<1x8x1xf32>
      tpu.vector_store %arg9[%c0_89, %c0_90, %c0_91], %81 {strides = array<i32>} : memref<1x8x1xf32, #tpu.memory_space<vmem>>, vector<1x8x1xf32>,
    } else {
    }
    return
  }
  func.func @transform_0(%arg0: i32, %arg1: i32, %arg2: i32) -> (i32, i32, i32, i32) {
    %c0_i32 = arith.constant 0 : i32
    %c0_i32_0 = arith.constant 0 : i32
    %c0_i32_1 = arith.constant 0 : i32
    return %arg0, %arg2, %c0_i32, %c0_i32_0 : i32, i32, i32, i32
  }
  func.func @transform_1(%arg0: i32, %arg1: i32, %arg2: i32) -> (i32, i32, i32) {
    %c0_i32 = arith.constant 0 : i32
    %c0_i32_0 = arith.constant 0 : i32
    return %arg0, %c0_i32, %arg2 : i32, i32, i32
  }
  func.func @transform_2(%arg0: i32, %arg1: i32, %arg2: i32) -> (i32, i32, i32, i32) {
    %c0_i32 = arith.constant 0 : i32
    %c0_i32_0 = arith.constant 0 : i32
    return %arg0, %arg2, %arg1, %c0_i32 : i32, i32, i32, i32
  }
  func.func @transform_3(%arg0: i32, %arg1: i32, %arg2: i32) -> (i32, i32) {
    %c0_i32 = arith.constant 0 : i32
    %c0_i32_0 = arith.constant 0 : i32
    return %arg1, %c0_i32 : i32, i32
  }
  func.func @transform_4(%arg0: i32, %arg1: i32, %arg2: i32) -> (i32, i32) {
    %c0_i32 = arith.constant 0 : i32
    %c0_i32_0 = arith.constant 0 : i32
    return %arg1, %c0_i32 : i32, i32
  }
  func.func @transform_5(%arg0: i32, %arg1: i32, %arg2: i32) -> (i32, i32) {
    %c0_i32 = arith.constant 0 : i32
    %c0_i32_0 = arith.constant 0 : i32
    return %arg1, %c0_i32 : i32, i32
  }
  func.func @transform_6(%arg0: i32, %arg1: i32, %arg2: i32) -> (i32, i32, i32) {
    %c0_i32 = arith.constant 0 : i32
    %c0_i32_0 = arith.constant 0 : i32
    return %arg0, %arg1, %c0_i32 : i32, i32, i32
  }
}

</mosaic_0001>

<bundles_post_ra>
// kernel: forward.6
= control target key start
LH: loop header
LB: loop body
LE: loop exit
PB: predicated region body
PF: predicated region fallthrough
CT: control target
= control target key end

     0   :  { %s425_s12 = smov 0   ;;  %s427_s13 = smov 0   ;;  %s464_s0 = inlined_call_operand.vmem [shape: bf16[16,8,16], index: 0, kind: input, shape index: {}]   ;;  %s465_s1 = inlined_call_operand.vmem [shape: bf16[4,8], index: 1, kind: input, shape index: {}]   ;;  %s466_s2 = inlined_call_operand.vmem [shape: f32[4,1], index: 2, kind: input, shape index: {}]   ;;  %s467_s3 = inlined_call_operand.vmem [shape: bf16[16,4,16], index: 3, kind: output, shape index: {}]  }
   0x1   :  { %s429_s14 = smov 0  }
   0x2 LB: > { %s25_s15 = sadd.s32 1, %s396_s13  ;;  %p336_p0 = scmp.ge.s32.totalorder %s400_s14, 1  ;;  %s400_s14 = sphi %s429_s14, %s13_s14   ;;  %s396_s13 = sphi %s427_s13, %s469_s13   ;;  %s392_s12 = sphi %s425_s12, %s468_s12  }
   0x3   : > { %p27_p1 = scmp.ge.s32.totalorder %s25_s15, 16  ;;  %p155_p2 = scmp.lt.s32.totalorder %s400_s14, 17 }
   0x5   : > { %s471_s15 = smov (%p27_p1, %s25_s15), 0  ;;  %p156_p3 = pnand %p336_p0, %p155_p2 }
   0x6   : > { %p183_p4 = scmp.lt.s32.totalorder (!%p156_p3), %s392_s12, 15  ;;  %v402_v0 = vmov (!%p156_p3), 0.0   ;;  %vm403_vm0 = vmmov (!%p156_p3), 0   ;;  %v200_v1 = vld [vmem:[%s466_s2] sm:$0xf] (!%p156_p3)  ;;  %v404_v2 = vmov (!%p156_p3), 0  }
   0x7   : > { %159 = sbr.rel (%p156_p3) target bundleno = 241 (0xf1), region = 32  ;;  %344 = vmatprep.subr.bf16.mxu0 (!%p156_p3), %v402_v0  ;;  %346 = vmatprep.mubr.msk.bf16.mxu0 (!%p156_p3), %vm403_vm0, %v402_v0  ;;  %vm210_vm1 = vcmask (!%p156_p3), 1043456   ;;  %v198_v5 = vld [vmem:[%s465_s1] sm:$0x3] (!%p156_p3)  ;;  %vm206_vm2 = vcmask (!%p156_p3), 64512   ;;  %vm256_vm3 = vcmask (!%p156_p3), 123904  }
   0x8   : > { %377 = vset.pattern.permute.xlu0 (!%p156_p3), %v404_v2 }
   0x9   : > { %203 = vperm.xlu0 (!%p156_p3), %377, %v200_v1  }
   0xe   : > { %s473_s12 = smov (!%p183_p4, %s392_s12), 15 }
   0xf   : > { %s337_s18 = sshll.u32 %s473_s12, 2  ;;  %s338_s24 = sshll.u32 %s473_s12, 1 }
  0x10   : > { %s189_s21 = scalar_lea.vmem %s464_s0, %s337_s18  ;;  %s196_s27 = scalar_lea.vmem %s467_s3, %s338_s24 }
  0x11   : > { %v199_v3 = vld [vmem:[%s189_s21] sm:$0xf] }
  0x12   : > { %v212_v4 = vsel %vm210_vm1, %v199_v3, 0 }
  0x13   : > { %345 = vmatpush3.bf16.msra.mxu0 %v212_v4 }
  0x16   : > { %347 = vmatmul.mubr.msk.bf16.vlgmr.msra.gmra.mrb[0].mxu0 %vm206_vm2, %v198_v5 }
  0x88   : > { %v204_v6 = vpop.permute.xlu0 %203 }
  0xe9   : > { %v248_v7 = vpop.f32.mrb[0].mxu0 }
  0xea   : > { %v249_v8 = vadd.f32 %v248_v7, %v204_v6  ;;  %v348_v9 = vpop.f32.mrb[1].mxu0 }
  0xeb   : > { %v251_v10 = vpop.f32.mrb[2].mxu0 }
  0xec   : > { %v254_v11 = vmax.f32 %v249_v8, 0.0  ;;  %v349_v12 = vpop.f32.mrb[3].mxu0 }
  0xee   : > { %v255_v13 = vpack.c.bf16 %v254_v11, %v254_v11 }
  0xf0   : > { %257 = vst.msk [vmem:[%s196_s27] sm:$0x3] %vm256_vm3, %v255_v13 }
  0xf1 PF: > { %s13_s14 = sadd.s32 1, %s400_s14   ;;  %s468_s12 = smov %s396_s13 }
  0xf2   : > { %p10_p5 = scmp.ge.s32.totalorder %s13_s14, 18   ;;  %s469_s13 = smov %s471_s15 }
  0xf4   :  { %12 = sbr.rel (!%p10_p5) target bundleno = 2 (0x2), region = 62 }

// kernel: forward.8
= control target key start
LH: loop header
LB: loop body
LE: loop exit
PB: predicated region body
PF: predicated region fallthrough
CT: control target
= control target key end

     0   :  { %s425_s12 = smov 0   ;;  %s427_s13 = smov 0   ;;  %s464_s0 = inlined_call_operand.vmem [shape: bf16[2,8,16], index: 0, kind: input, shape index: {}]   ;;  %s465_s1 = inlined_call_operand.vmem [shape: bf16[4,8], index: 1, kind: input, shape index: {}]   ;;  %s466_s2 = inlined_call_operand.vmem [shape: f32[4,1], index: 2, kind: input, shape index: {}]   ;;  %s467_s3 = inlined_call_operand.vmem [shape: bf16[2,4,16], index: 3, kind: output, shape index: {}]  }
   0x1   :  { %s429_s14 = smov 0  }
   0x2 LB: > { %s25_s15 = sadd.s32 1, %s396_s13  ;;  %p336_p0 = scmp.ge.s32.totalorder %s400_s14, 1  ;;  %s400_s14 = sphi %s429_s14, %s13_s14   ;;  %s396_s13 = sphi %s427_s13, %s469_s13   ;;  %s392_s12 = sphi %s425_s12, %s468_s12  }
   0x3   : > { %p27_p1 = scmp.ge.s32.totalorder %s25_s15, 2  ;;  %p155_p2 = scmp.lt.s32.totalorder %s400_s14, 3 }
   0x5   : > { %s471_s15 = smov (%p27_p1, %s25_s15), 0  ;;  %p156_p3 = pnand %p336_p0, %p155_p2 }
   0x6   : > { %p183_p4 = scmp.lt.s32.totalorder (!%p156_p3), %s392_s12, 1  ;;  %v402_v0 = vmov (!%p156_p3), 0.0   ;;  %vm403_vm0 = vmmov (!%p156_p3), 0   ;;  %v200_v1 = vld [vmem:[%s466_s2] sm:$0xf] (!%p156_p3)  ;;  %v404_v2 = vmov (!%p156_p3), 0  }
   0x7   : > { %159 = sbr.rel (%p156_p3) target bundleno = 241 (0xf1), region = 32  ;;  %344 = vmatprep.subr.bf16.mxu0 (!%p156_p3), %v402_v0  ;;  %346 = vmatprep.mubr.msk.bf16.mxu0 (!%p156_p3), %vm403_vm0, %v402_v0  ;;  %vm210_vm1 = vcmask (!%p156_p3), 1043456   ;;  %v198_v5 = vld [vmem:[%s465_s1] sm:$0x3] (!%p156_p3)  ;;  %vm206_vm2 = vcmask (!%p156_p3), 64512   ;;  %vm256_vm3 = vcmask (!%p156_p3), 123904  }
   0x8   : > { %377 = vset.pattern.permute.xlu0 (!%p156_p3), %v404_v2 }
   0x9   : > { %203 = vperm.xlu0 (!%p156_p3), %377, %v200_v1  }
   0xe   : > { %s473_s12 = smov (!%p183_p4, %s392_s12), 1 }
   0xf   : > { %s337_s18 = sshll.u32 %s473_s12, 2  ;;  %s338_s24 = sshll.u32 %s473_s12, 1 }
  0x10   : > { %s189_s21 = scalar_lea.vmem %s464_s0, %s337_s18  ;;  %s196_s27 = scalar_lea.vmem %s467_s3, %s338_s24 }
  0x11   : > { %v199_v3 = vld [vmem:[%s189_s21] sm:$0xf] }
  0x12   : > { %v212_v4 = vsel %vm210_vm1, %v199_v3, 0 }
  0x13   : > { %345 = vmatpush3.bf16.msra.mxu0 %v212_v4 }
  0x16   : > { %347 = vmatmul.mubr.msk.bf16.vlgmr.msra.gmra.mrb[0].mxu0 %vm206_vm2, %v198_v5 }
  0x88   : > { %v204_v6 = vpop.permute.xlu0 %203 }
  0xe9   : > { %v248_v7 = vpop.f32.mrb[0].mxu0 }
  0xea   : > { %v249_v8 = vadd.f32 %v248_v7, %v204_v6  ;;  %v348_v9 = vpop.f32.mrb[1].mxu0 }
  0xeb   : > { %v251_v10 = vpop.f32.mrb[2].mxu0 }
  0xec   : > { %v254_v11 = vmax.f32 %v249_v8, 0.0  ;;  %v349_v12 = vpop.f32.mrb[3].mxu0 }
  0xee   : > { %v255_v13 = vpack.c.bf16 %v254_v11, %v254_v11 }
  0xf0   : > { %257 = vst.msk [vmem:[%s196_s27] sm:$0x3] %vm256_vm3, %v255_v13 }
  0xf1 PF: > { %s13_s14 = sadd.s32 1, %s400_s14   ;;  %s468_s12 = smov %s396_s13 }
  0xf2   : > { %p10_p5 = scmp.ge.s32.totalorder %s13_s14, 4   ;;  %s469_s13 = smov %s471_s15 }
  0xf4   :  { %12 = sbr.rel (!%p10_p5) target bundleno = 2 (0x2), region = 62 }

// kernel: forward.9
= control target key start
LH: loop header
LB: loop body
LE: loop exit
PB: predicated region body
PF: predicated region fallthrough
CT: control target
= control target key end

     0   :  { %s453_s9 = smov 0   ;;  %s455_s10 = smov 0   ;;  %s489_s0 = inlined_call_operand.vmem [shape: bf16[2,16,4], index: 0, kind: input, shape index: {}]   ;;  %s490_s1 = inlined_call_operand.vmem [shape: bf16[2,4,128], index: 1, kind: input, shape index: {}]   ;;  %s491_s2 = inlined_call_operand.vmem [shape: bf16[2,16,128], index: 2, kind: output, shape index: {}]  }
   0x1   :  { %s457_s11 = smov 0  }
   0x2 LB: > { %s24_s12 = sadd.s32 1, %s430_s10  ;;  %p356_p0 = scmp.ge.s32.totalorder %s434_s11, 1  ;;  %s434_s11 = sphi %s457_s11, %s12_s11   ;;  %s430_s10 = sphi %s455_s10, %s493_s10   ;;  %s426_s9 = sphi %s453_s9, %s492_s9  }
   0x3   : > { %p26_p1 = scmp.ge.s32.totalorder %s24_s12, 2  ;;  %p140_p2 = scmp.lt.s32.totalorder %s434_s11, 3 }
   0x5   : > { %s495_s12 = smov (%p26_p1, %s24_s12), 0  ;;  %p141_p3 = pnand %p356_p0, %p140_p2 }
   0x6   : > { %p172_p4 = scmp.lt.s32.totalorder (!%p141_p3), %s426_s9, 1  ;;  %v436_v0 = vmov (!%p141_p3), 0.0   ;;  %vm437_vm0 = vmmov (!%p141_p3), 0   ;;  %vm205_vm1 = vcmask (!%p141_p3), 1041408   ;;  %vm201_vm2 = vcmask (!%p141_p3), 31744  }
   0x7   : > { %144 = sbr.rel (%p141_p3) target bundleno = 239 (0xef), region = 28  ;;  %379 = vmatprep.subr.bf16.mxu0 (!%p141_p3), %v436_v0  ;;  %381 = vmatprep.mubr.msk.bf16.mxu0 (!%p141_p3), %vm437_vm0, %v436_v0 }
   0xe   : > { %s497_s9 = smov (!%p172_p4, %s426_s9), 1 }
   0xf   : > { %s368_s13 = sshll.u32 %s497_s9, 3  ;;  %s359_s14 = sshll.u32 %s497_s9, 1 }
  0x10   : > { %s176_s17 = scalar_lea.vmem %s489_s0, %s368_s13  ;;  %s183_s20 = scalar_lea.vmem %s490_s1, %s359_s14 }
  0x11   : > { %v195_v1 = vld [vmem:[%s183_s20] sm:$0x3]  ;;  %s191_s23 = scalar_lea.vmem %s491_s2, %s368_s13 }
  0x12   : > { %v207_v2 = vsel %vm205_vm1, %v195_v1, 0  ;;  %v411_v3 = vld [vmem:[%s176_s17] sm:$0xff]  }
  0x13   : > { %380 = vmatpush3.bf16.msra.mxu0 %v207_v2 }
  0x16   : > { %382 = vmatmul.mubr.msk.bf16.vlgmr.msra.gmra.mrb[0].mxu0 %vm201_vm2, %v411_v3 }
  0xe9   : > { %v243_v4 = vpop.f32.mrb[0].mxu0 }
  0xea   : > { %v383_v5 = vpop.f32.mrb[1].mxu0 }
  0xeb   : > { %v246_v6 = vpop.f32.mrb[2].mxu0 }
  0xec   : > { %v375_v7 = vpack.c.bf16 %v246_v6, %v243_v4  ;;  %v384_v8 = vpop.f32.mrb[3].mxu0 }
  0xee   : > { %376 = vst [vmem:[%s191_s23] sm:$0xff] %v375_v7  }
  0xef PF: > { %s12_s11 = sadd.s32 1, %s434_s11   ;;  %s492_s9 = smov %s430_s10 }
  0xf0   : > { %p9_p5 = scmp.ge.s32.totalorder %s12_s11, 4   ;;  %s493_s10 = smov %s495_s12 }
  0xf2   :  { %11 = sbr.rel (!%p9_p5) target bundleno = 2 (0x2), region = 61 }

// kernel: forward.10
= control target key start
LH: loop header
LB: loop body
LE: loop exit
PB: predicated region body
PF: predicated region fallthrough
CT: control target
= control target key end

     0   :  { %s437_s12 = smov 0   ;;  %s439_s13 = smov 0   ;;  %s476_s0 = inlined_call_operand.vmem [shape: bf16[2,16,128], index: 0, kind: input, shape index: {}]   ;;  %s477_s1 = inlined_call_operand.vmem [shape: bf16[8,16], index: 1, kind: input, shape index: {}]   ;;  %s478_s2 = inlined_call_operand.vmem [shape: f32[8,1], index: 2, kind: input, shape index: {}]   ;;  %s479_s3 = inlined_call_operand.vmem [shape: bf16[2,8,128], index: 3, kind: output, shape index: {}]  }
   0x1   :  { %s441_s14 = smov 0  }
   0x2 LB: > { %s25_s15 = sadd.s32 1, %s408_s13  ;;  %p344_p0 = scmp.ge.s32.totalorder %s412_s14, 1  ;;  %s412_s14 = sphi %s441_s14, %s13_s14   ;;  %s408_s13 = sphi %s439_s13, %s481_s13   ;;  %s404_s12 = sphi %s437_s12, %s480_s12  }
   0x3   : > { %p27_p1 = scmp.ge.s32.totalorder %s25_s15, 2  ;;  %p156_p2 = scmp.lt.s32.totalorder %s412_s14, 3 }
   0x5   : > { %s483_s15 = smov (%p27_p1, %s25_s15), 0  ;;  %p157_p3 = pnand %p344_p0, %p156_p2 }
   0x6   : > { %p185_p4 = scmp.lt.s32.totalorder (!%p157_p3), %s404_s12, 1  ;;  %v414_v0 = vmov (!%p157_p3), 0.0   ;;  %vm415_vm0 = vmmov (!%p157_p3), 0   ;;  %v204_v1 = vld [vmem:[%s478_s2] sm:$0xff] (!%p157_p3)  ;;  %v416_v2 = vmov (!%p157_p3), 0   ;;  %vm216_vm1 = vcmask (!%p157_p3), 130048  }
   0x7   : > { %160 = sbr.rel (%p157_p3) target bundleno = 240 (0xf0), region = 32  ;;  %355 = vmatprep.subr.bf16.mxu0 (!%p157_p3), %v414_v0  ;;  %357 = vmatprep.mubr.msk.bf16.mxu0 (!%p157_p3), %vm415_vm0, %v414_v0  ;;  %v201_v4 = vld [vmem:[%s477_s1] sm:$0xf] (!%p157_p3) }
   0x8   : > { %388 = vset.pattern.permute.xlu0 (!%p157_p3), %v416_v2 }
   0x9   : > { %207 = vperm.xlu0 (!%p157_p3), %388, %v204_v1  }
   0xe   : > { %s485_s12 = smov (!%p185_p4, %s404_s12), 1 }
   0xf   : > { %s352_s18 = sshll.u32 %s485_s12, 3  ;;  %s347_s24 = sshll.u32 %s485_s12, 2 }
  0x10   : > { %s192_s21 = scalar_lea.vmem %s476_s0, %s352_s18  ;;  %s199_s27 = scalar_lea.vmem %s479_s3, %s347_s24 }
  0x11   : > { %v389_v3 = vld [vmem:[%s192_s21] sm:$0xff]  }
  0x12   : > { %356 = vmatpush3.bf16.msra.mxu0 %v389_v3 }
  0x15   : > { %358 = vmatmul.mubr.msk.bf16.vlgmr.msra.gmra.mrb[0].mxu0 %vm216_vm1, %v201_v4 }
  0x88   : > { %v208_v5 = vpop.permute.xlu0 %207 }
  0xe8   : > { %v254_v6 = vpop.f32.mrb[0].mxu0 }
  0xe9   : > { %v255_v7 = vadd.f32 %v254_v6, %v208_v5  ;;  %v359_v8 = vpop.f32.mrb[1].mxu0 }
  0xea   : > { %v257_v9 = vpop.f32.mrb[2].mxu0 }
  0xeb   : > { %v260_v10 = vmax.f32 %v255_v7, 0.0  ;;  %v360_v11 = vpop.f32.mrb[3].mxu0 }
  0xed   : > { %v261_v12 = vpack.c.bf16 %v260_v10, %v260_v10 }
  0xef   : > { %262 = vst [vmem:[%s199_s27] sm:$0xf] %v261_v12 }
  0xf0 PF: > { %s13_s14 = sadd.s32 1, %s412_s14   ;;  %s480_s12 = smov %s408_s13 }
  0xf1   : > { %p10_p5 = scmp.ge.s32.totalorder %s13_s14, 4   ;;  %s481_s13 = smov %s483_s15 }
  0xf3   :  { %12 = sbr.rel (!%p10_p5) target bundleno = 2 (0x2), region = 62 }

// kernel: forward.11
= control target key start
LH: loop header
LB: loop body
LE: loop exit
PB: predicated region body
PF: predicated region fallthrough
CT: control target
= control target key end

     0   :  { %s1092_s21 = smov 0   ;;  %s1094_s22 = smov 0   ;;  %s1207_s0 = inlined_call_operand.vmem [shape: bf16[2,8,4,16], index: 0, kind: input, shape index: {}]   ;;  %s1208_s1 = inlined_call_operand.vmem [shape: bf16[2,8,128], index: 1, kind: input, shape index: {}]   ;;  %s1209_s2 = inlined_call_operand.vmem [shape: bf16[2,8,8,16], index: 2, kind: input, shape index: {}]   ;;  %s1210_s3 = inlined_call_operand.vmem [shape: bf16[8,4], index: 3, kind: input, shape index: {}]   ;;  %s1211_s4 = inlined_call_operand.vmem [shape: bf16[8,8], index: 4, kind: input, shape index: {}]   ;;  %s1212_s5 = inlined_call_operand.vmem [shape: f32[8,1], index: 5, kind: input, shape index: {}]   ;;  %s1213_s6 = inlined_call_operand.vmem [shape: f32[2,8,1], index: 6, kind: output, shape index: {}]  }
   0x1   :  { %s1096_s23 = smov 0  }
   0x2 LB: > { %s35_s24 = sadd.s32 1, %s1040_s22  ;;  %p915_p0 = scmp.ge.s32.totalorder %s1044_s23, 1  ;;  %s1044_s23 = sphi %s1096_s23, %s16_s23   ;;  %s1040_s22 = sphi %s1094_s22, %s1215_s22   ;;  %s1036_s21 = sphi %s1092_s21, %s1214_s21  }
   0x3   : > { %p37_p1 = scmp.ge.s32.totalorder %s35_s24, 2  ;;  %p303_p2 = scmp.lt.s32.totalorder %s1044_s23, 3 }
   0x5   : > { %s1217_s24 = smov (%p37_p1, %s35_s24), 0  ;;  %p304_p3 = pnand %p915_p0, %p303_p2 }
   0x6   : > { %p371_p4 = scmp.lt.s32.totalorder (!%p304_p3), %s1036_s21, 1  ;;  %v1046_v0 = vmov (!%p304_p3), 0.0   ;;  %vm1047_vm0 = vmmov (!%p304_p3), 0   ;;  %s1048_s29 = smov (!%p304_p3), 16   ;;  %vm609_vm1 = vcmask (!%p304_p3), 1043456   ;;  %vm605_vm2 = vcmask (!%p304_p3), 64512  }
   0x7   : > { %307 = sbr.rel (%p304_p3) target bundleno = 828 (0x33c), region = 44  ;;  %960 = vmatprep.subr.bf16.mxu0 (!%p304_p3), %v1046_v0  ;;  %966 = vmatprep.subr.bf16.mxu1 (!%p304_p3), %v1046_v0  ;;  %s1049_s30 = smov (!%p304_p3), 48   ;;  %v603_v7 = vld [vmem:[%s1211_s4] sm:$0xf] (!%p304_p3)  ;;  %v1052_v10 = vmov (!%p304_p3), 0   ;;  %vm513_vm3 = vcmask (!%p304_p3), 130048  }
   0x8   : > { %962 = vmatprep.mubr.msk.bf16.mxu0 (!%p304_p3), %vm1047_vm0, %v1046_v0  ;;  %968 = vmatprep.mubr.msk.bf16.mxu1 (!%p304_p3), %vm1047_vm0, %v1046_v0  ;;  %s1050_s11 = smov (!%p304_p3), 32   ;;  %s1051_s14 = smov (!%p304_p3), 64   ;;  %v700_v12 = vld [vmem:[%s1212_s5] sm:$0xff] (!%p304_p3)  ;;  %vm517_vm4 = vcmask (!%p304_p3), 261120   ;;  %vm520_vm5 = vcmask (!%p304_p3), 392192   ;;  %vm523_vm6 = vcmask (!%p304_p3), 523264  }
   0x9   : > { %1007 = vset.pattern.permute.xlu1 (!%p304_p3), %v1052_v10  ;;  %1008 = vset.pattern.permute.xlu0 (!%p304_p3), %v1052_v10  ;;  %s1053_s15 = smov (!%p304_p3), 80   ;;  %s1054_s16 = smov (!%p304_p3), 96   ;;  %vm526_vm7 = vcmask (!%p304_p3), 654336   ;;  %vm529_vm8 = vcmask (!%p304_p3), 785408   ;;  %vm532_vm9 = vcmask (!%p304_p3), 916480   ;;  %vm657_vm10 = vcmask (!%p304_p3), 1041408  }
   0xa   : > { %s1055_s19 = smov (!%p304_p3), 112   ;;  %v602_v29 = vld [vmem:[%s1210_s3] sm:$0xf] (!%p304_p3)  ;;  %vm653_vm11 = vcmask (!%p304_p3), 31744   ;;  %vm424_vm12 = vcmask (!%p304_p3), 7168   ;;  %v1056_v34 = vmov (!%p304_p3), -inf  }
   0xb   : > { %425 = vst.msk [vmem:[#allocation2] sm:$0xff] (!%p304_p3), %vm424_vm12, %v1056_v34  ;;  %426 = vst.msk [vmem:[#allocation3] sm:$0xff] (!%p304_p3), %vm424_vm12, %v1046_v0 }
   0xc   : > { %427 = vst.msk [vmem:[#allocation4] sm:$0xff] (!%p304_p3), %vm424_vm12, %v1046_v0 }
   0xe   : > { %s1219_s21 = smov (!%p371_p4, %s1036_s21), 1 }
   0xf   : > { %s954_s25 = sshll.u32 %s1219_s21, 4  ;;  %s918_s7 = sshll.u32 %s1219_s21, 2 }
  0x10   : > { %s1118_s28 = scalar_lea.vmem %s1207_s0, %s954_s25  ;;  %s386_s10 = scalar_lea.vmem %s1208_s1, %s918_s7 }
  0x11   : > { %v929_v1 = vld.sshfl [vmem:[%s1118_s28 + $0x2] sm:$0x3 pattern:$0x76325410]  ;;  %v428_v14 = vld [vmem:[%s1118_s28] sm:$0x3] }
  0x12   : > { %451 = vrot.lane.b32.xlu0 %v929_v1, %s1048_s29  ;;  %v931_v2 = vld.sshfl [vmem:[%s1118_s28 + $0x6] sm:$0x3 pattern:$0x76325410]  ;;  %v604_v5 = vld [vmem:[%s386_s10] sm:$0xf] }
  0x13   : > { %471 = vrot.lane.b32.xlu1 %v931_v2, %s1049_s30  ;;  %v930_v3 = vld.sshfl [vmem:[%s1118_s28 + $0x4] sm:$0x3 pattern:$0x76325410]  ;;  %v611_v6 = vsel %vm609_vm1, %v604_v5, 0  ;;  %s955_s26 = sshll.u32 %s1219_s21, 5 }
  0x14   : > { %v932_v4 = vld.sshfl [vmem:[%s1118_s28 + $0x8] sm:$0x3 pattern:$0x76325410]  ;;  %961 = vmatpush3.bf16.msra.mxu0 %v611_v6  ;;  %s1166_s7 = scalar_lea.vmem %s1209_s2, %s955_s26  ;;  %v708_v43 = vld [vmem:[#allocation2] sm:$0xff] }
  0x15   : > { %v933_v8 = vld.sshfl [vmem:[%s1118_s28 + $0xa] sm:$0x3 pattern:$0x76325410]  ;;  %v1009_v47 = vld [vmem:[%s1166_s7 + $0x4] ss:$0 sps:$4 sm:$0xff]  }
  0x16   : > { %461 = vrot.lane.b32.xlu0 %v930_v3, %s1050_s11  ;;  %v934_v9 = vld.sshfl [vmem:[%s1118_s28 + $0xc] sm:$0x3 pattern:$0x76325410]  ;;  %v1010_v48 = vld [vmem:[%s1166_s7 + $0x8] ss:$0 sps:$4 sm:$0xff]  }
  0x17   : > { %481 = vrot.lane.b32.xlu1 %v932_v4, %s1051_s14  ;;  %963 = vmatmul.mubr.msk.bf16.vlgmr.msra.gmra.mrb[0].mxu0 %vm605_vm2, %v603_v7  ;;  %v935_v11 = vld.sshfl [vmem:[%s1118_s28 + $0xe] sm:$0x3 pattern:$0x76325410]  ;;  %v1011_v49 = vld [vmem:[%s1166_s7 + $0xc] ss:$0 sps:$4 sm:$0xff]  }
  0x18   : > { %v1012_v50 = vld [vmem:[%s1166_s7 + $0x10] ss:$0 sps:$4 sm:$0xff]   ;;  %v1013_v51 = vld [vmem:[%s1166_s7 + $0x14] ss:$0 sps:$4 sm:$0xff]   ;;  %v1014_v52 = vld [vmem:[%s1166_s7 + $0x18] ss:$0 sps:$4 sm:$0xff]  }
  0x19   : > { %v1015_v53 = vld [vmem:[%s1166_s7 + $0x1c] ss:$0 sps:$4 sm:$0xff]   ;;  %v535_v62 = vld [vmem:[%s1166_s7] sm:$0xf] }
  0x1a   : > { %491 = vrot.lane.b32.xlu0 %v933_v8, %s1053_s15 }
  0x1b   : > { %501 = vrot.lane.b32.xlu1 %v934_v9, %s1054_s16 }
  0x1e   : > { %511 = vrot.lane.b32.xlu0 %v935_v11, %s1055_s19 }
  0x1f   : > { %703 = vperm.xlu1 %1007, %v700_v12  }
  0x84   : > { %v452_v13 = vpop.permute.xlu0 %451 }
  0x85   : > { %v472_v15 = vpop.permute.xlu1 %471  ;;  %v516_v16 = vsel %vm513_vm3, %v428_v14, %v452_v13  ;;  %v723_v13 = vld [vmem:[#allocation3] sm:$0xff] }
  0x88   : > { %v462_v17 = vpop.permute.xlu0 %461 }
  0x89   : > { %v519_v18 = vsel %vm517_vm4, %v516_v16, %v462_v17  ;;  %v482_v19 = vpop.permute.xlu1 %481  ;;  %v730_v17 = vld [vmem:[#allocation4] sm:$0xff] }
  0x8a   : > { %v522_v20 = vsel %vm520_vm5, %v519_v18, %v472_v15 }
  0x8b   : > { %v525_v21 = vsel %vm523_vm6, %v522_v20, %v482_v19 }
  0x8c   : > { %v492_v22 = vpop.permute.xlu0 %491 }
  0x8d   : > { %v528_v23 = vsel %vm526_vm7, %v525_v21, %v492_v22  ;;  %v502_v24 = vpop.permute.xlu1 %501 }
  0x8e   : > { %v531_v25 = vsel %vm529_vm8, %v528_v23, %v502_v24 }
  0x90   : > { %v512_v26 = vpop.permute.xlu0 %511 }
  0x91   : > { %v534_v27 = vsel %vm532_vm9, %v531_v25, %v512_v26 }
  0x92   : > { %v658_v28 = vsel %vm657_vm10, %v534_v27, 0 }
  0x93   : > { %967 = vmatpush3.bf16.msra.mxu1 %v658_v28 }
  0x96   : > { %969 = vmatmul.mubr.msk.bf16.vlgmr.msra.gmra.mrb[0].mxu1 %vm653_vm11, %v602_v29 }
  0x9e   : > { %v704_v36 = vpop.permute.xlu1 %703 }
  0xea   : > { %v647_v30 = vpop.f32.mrb[0].mxu0 }
  0xeb   : > { %v964_v31 = vpop.f32.mrb[1].mxu0 }
  0xec   : > { %v650_v32 = vpop.f32.mrb[2].mxu0 }
  0xed   : > { %v965_v33 = vpop.f32.mrb[3].mxu0 }
 0x169   : > { %v694_v35 = vpop.f32.mrb[0].mxu1 }
 0x16a   : > { %v695_v37 = vadd.f32 %v694_v35, %v647_v30  ;;  %v970_v38 = vpop.f32.mrb[1].mxu1 }
 0x16b   : > { %v697_v39 = vpop.f32.mrb[2].mxu1 }
 0x16c   : > { %v706_v40 = vadd.f32 %v704_v36, %v695_v37  ;;  %v971_v41 = vpop.f32.mrb[3].mxu1 }
 0x16e   : > { %v707_v42 = vmax.f32 %v706_v40, 0.0 }
 0x170   : > { %709 = vmax.xlane.f32.xlu0 %v707_v42 }
 0x1fd   : > { %v710_v44 = vpop.xlane.xlu0 %709 }
 0x1fe   : > { %v711_v45 = vmax.f32 %v708_v43, %v710_v44 }
 0x200   : > { %v712_v46 = vsub.f32 %v708_v43, %v711_v45  ;;  %737 = vst.msk [vmem:[#allocation2] sm:$0xff] %vm424_vm12, %v711_v45  ;;  %717 = vperm.xlu1 %1007, %v711_v45  }
 0x202   : > { %v713_v11 = vmul.f32 1.442695, %v712_v46 }
 0x204   : > { %553 = vrot.lane.b32.xlu1 %v1009_v47, %s1048_s29  ;;  %s921_s29 = sshll.u32 %s1219_s21, 3 }
 0x205   : > { %s418_s9 = scalar_lea.vmem %s1213_s6, %s921_s29 }
 0x208   : > { %558 = vrot.lane.b32.xlu1 %v1010_v48, %s1050_s11 }
 0x20c   : > { %563 = vrot.lane.b32.xlu1 %v1011_v49, %s1049_s30 }
 0x210   : > { %568 = vrot.lane.b32.xlu1 %v1012_v50, %s1051_s14 }
 0x214   : > { %573 = vrot.lane.b32.xlu1 %v1013_v51, %s1053_s15 }
 0x218   : > { %578 = vrot.lane.b32.xlu1 %v1014_v52, %s1054_s16 }
 0x21c   : > { %583 = vrot.lane.b32.xlu1 %v1015_v53, %s1055_s19 }
 0x27f   : > { %v718_v54 = vpop.permute.xlu1 %717 }
 0x280   : > { %v720_v55 = vsub.f32 %v707_v42, %v718_v54 }
 0x282   : > { %v721_v56 = vmul.f32 1.442695, %v720_v55 }
 0x283   : > { %v554_v57 = vpop.permute.xlu1 %553 }
 0x284   : > { %1016 = vpow2.f32 %v721_v56  ;;  %v587_v0 = vsel %vm513_vm3, %v535_v62, %v554_v57 }
 0x285   : > { %1018 = vpow2.f32 %v713_v11 }
 0x287   : > { %v559_v58 = vpop.permute.xlu1 %558 }
 0x288   : > { %v589_v1 = vsel %vm517_vm4, %v587_v0, %v559_v58 }
 0x28b   : > { %v564_v59 = vpop.permute.xlu1 %563 }
 0x28c   : > { %v591_v3 = vsel %vm520_vm5, %v589_v1, %v564_v59 }
 0x28e   : > { %v1017_v60 = vpop.eup %1016 }
 0x28f   : > { %725 = vadd.xlane.f32.xlu0 %v1017_v60  ;;  %v569_v61 = vpop.permute.xlu1 %568  ;;  %v1019_v12 = vpop.eup %1018 }
 0x290   : > { %v593_v4 = vsel %vm523_vm6, %v591_v3, %v569_v61  ;;  %v724_v14 = vmul.f32 %v1019_v12, %v723_v13  ;;  %v731_v19 = vmul.f32 %v1019_v12, %v730_v17 }
 0x293   : > { %v574_v63 = vpop.permute.xlu1 %573 }
 0x294   : > { %v595_v5 = vsel %vm526_vm7, %v593_v4, %v574_v63 }
 0x297   : > { %v579_v2 = vpop.permute.xlu1 %578 }
 0x298   : > { %v597_v6 = vsel %vm529_vm8, %v595_v5, %v579_v2 }
 0x29b   : > { %v584_v7 = vpop.permute.xlu1 %583 }
 0x29c   : > { %v599_v8 = vsel %vm532_vm9, %v597_v6, %v584_v7 }
 0x29d   : > { %v601_v9 = vunpack.c.l.bf16 %v599_v8 }
 0x29f   : > { %v732_v10 = vmul.f32 %v1017_v60, %v601_v9 }
 0x2a1   : > { %733 = vadd.xlane.f32.xlu1 %v732_v10 }
 0x31c   : > { %v726_v15 = vpop.xlane.xlu0 %725 }
 0x31d   : > { %v727_v16 = vadd.f32 %v726_v15, %v724_v14 }
 0x31f   : > { %729 = vst.msk [vmem:[#allocation3] sm:$0xff] %vm424_vm12, %v727_v16 }
 0x326   : > { %v742_v18 = vld [vmem:[#allocation3] sm:$0xff] }
 0x327   : > { %1020 = vrcp.f32 %v742_v18 }
 0x32e   : > { %v734_v20 = vpop.xlane.xlu1 %733 }
 0x32f   : > { %v735_v21 = vadd.f32 %v734_v20, %v731_v19 }
 0x331   : > { %736 = vst.msk [vmem:[#allocation4] sm:$0xff] %vm424_vm12, %v735_v21  ;;  %v1021_v22 = vpop.eup %1020 }
 0x338   : > { %v741_v23 = vld [vmem:[#allocation4] sm:$0xff] }
 0x339   : > { %v744_v24 = vmul.f32 %v1021_v22, %v741_v23 }
 0x33b   : > { %745 = vst.msk [vmem:[%s418_s9] sm:$0xff] %vm424_vm12, %v744_v24 }
 0x33c PF: > { %s16_s23 = sadd.s32 1, %s1044_s23   ;;  %s1214_s21 = smov %s1040_s22 }
 0x33d   : > { %p13_p5 = scmp.ge.s32.totalorder %s16_s23, 4   ;;  %s1215_s22 = smov %s1217_s24 }
 0x33f   :  { %15 = sbr.rel (!%p13_p5) target bundleno = 2 (0x2), region = 111 }

</bundles_post_ra>
